<compile_context>
chip_gen: v5e
topology: v5e:2x2
jax: 0.10.0
libtpu: 0.0.40
codegen_flags: <defaults>
</compile_context>

<pallas_src>
import functools

import jax
import jax.numpy as jnp
from jax.experimental import pallas as pl
from jax.experimental.pallas import tpu as pltpu

_LANES = 128


def _vmem_capacity_bytes():
    """Per-core VMEM capacity; conservative (v7x) fallback if query fails."""
    try:
        info = pltpu.get_tpu_info()
        cap = getattr(info, "vmem_capacity_bytes", None)
        if cap:
            return int(cap)
    except Exception:
        pass
    return 64 * 1024 * 1024


def _dice_kernel(x_ref, t_ref, out_ref, *, num_classes, ignore_index,
                 tile_rows, rows_total, tiles_per_split, out_rows, mask_needed):
    """Accumulates per-(split, batch) partial sums for soft Dice.

    x_ref:   (C, TR, 128)        logits tile (cast to f32 in-kernel)
    t_ref:   (TR, 128)           integer targets tile (native dtype)
    out_ref: (out_rows, 128)     rows 0..C-1 = per-class intersection lane
                                 partials, row C = valid-pixel count (== sum of
                                 softmax probs), row C+1 = raw-label sum.
    """
    r = pl.program_id(2)

    @pl.when(r == 0)
    def _init():
        out_ref[...] = jnp.zeros_like(out_ref)

    x = x_ref[...].astype(jnp.float32)            # (C, TR, 128)
    tgt = t_ref[...].astype(jnp.int32)            # (TR, 128)

    if mask_needed:
        # Rows past the true pixel count (ragged last tile, or a whole tile of
        # split-axis padding whose block index was clamped) may hold stale
        # data: neutralize the *targets* only — garbage logits can only produce
        # NaN/Inf probabilities which are never selected below.
        g = pl.program_id(0) * tiles_per_split + r
        limit = rows_total - g * tile_rows        # scalar; may be <= 0
        row_ids = jax.lax.broadcasted_iota(jnp.int32, (tile_rows, _LANES), 0)
        tgt = jnp.where(row_ids < limit, tgt, jnp.int32(ignore_index))

    valid = tgt != ignore_index                   # (TR, 128) bool
    validf = valid.astype(jnp.float32)
    # Ignored pixels get a class id that can never match (saves C ANDs).
    tgt_cls = jnp.where(valid, tgt, jnp.int32(-1))

    # Numerically-stable softmax over the (static, unrolled) class axis.
    # Everything is elementwise / a sublane reduce on fully occupied (TR, 128)
    # vregs; exp() is recomputed in the second loop instead of keeping C f32
    # planes live (EUP slot is otherwise idle, vreg/VMEM pressure halves).
    m = x[0]
    for c in range(1, num_classes):
        m = jnp.maximum(m, x[c])
    z = jnp.exp(x[0] - m)
    for c in range(1, num_classes):
        z = z + jnp.exp(x[c] - m)
    inv_z = 1.0 / z                               # one divide per pixel

    rows = []
    for c in range(num_classes):
        p_c = jnp.exp(x[c] - m) * inv_z                        # (TR, 128)
        sel = jnp.where(tgt_cls == c, p_c, 0.0)
        rows.append(jnp.sum(sel, axis=0, keepdims=True))       # (1, 128)
    # softmax rows sum to 1  ->  sum of probs over valid pixels == valid count.
    rows.append(jnp.sum(validf, axis=0, keepdims=True))
    rows.append(jnp.sum(tgt.astype(jnp.float32) * validf, axis=0, keepdims=True))
    if out_rows > num_classes + 2:
        rows.append(jnp.zeros((out_rows - num_classes - 2, _LANES), jnp.float32))

    # Single unmasked, 8-sublane-aligned accumulation into the resident block.
    out_ref[...] += jnp.concatenate(rows, axis=0)


def dice_loss_pallas(logits_nchw, target_nhw, *, ignore_index=255, smooth=1.0,
                     max_tile_pixels=262144):
    N, C, H, W = logits_nchw.shape
    HW = H * W

    # Free reshapes only — no NCHW transpose, no dtype-changing HBM copy.
    x = logits_nchw.reshape(N, C, HW)
    t = target_nhw
    if not jnp.issubdtype(t.dtype, jnp.integer):
        t = t.astype(jnp.int32)
    t = t.reshape(N, HW)

    # Pad the pixel axis to the 128-lane width only (padded pixels get
    # ignore_index so they contribute nothing to any sum).
    HW_pad = ((HW + _LANES - 1) // _LANES) * _LANES
    if HW_pad != HW:
        # TODO(synk): avoidable copy if callers guarantee H*W % 128 == 0.
        x = jnp.pad(x, ((0, 0), (0, 0), (0, HW_pad - HW)))
        t = jnp.pad(t, ((0, 0), (0, HW_pad - HW)), constant_values=ignore_index)

    R = HW_pad // _LANES
    x = x.reshape(N, C, R, _LANES)
    t = t.reshape(N, R, _LANES)

    x_b = jnp.dtype(x.dtype).itemsize
    t_b = jnp.dtype(t.dtype).itemsize
    # Sublane packing granularity of the narrowest input dtype.
    row_align = max(8, 32 // x_b, 32 // t_b)

    # Generation-aware VMEM budget (v7x: 64 MiB, v5e/v6e: 128 MiB per core).
    vmem_cap = _vmem_capacity_bytes()
    vmem_limit = max(32 * 1024 * 1024, min(int(0.55 * vmem_cap), 96 * 1024 * 1024))

    # Per sublane-row VMEM cost: double-buffered inputs + f32 temporaries.
    bytes_per_row = _LANES * (2 * C * x_b + 2 * t_b + 4 * (C + 8))
    rows_cap = max(row_align, (vmem_limit - (4 << 20)) // bytes_per_row)
    rows_cap = min(rows_cap, max(row_align, max_tile_pixels // _LANES))
    rows_cap = max(row_align, (rows_cap // row_align) * row_align)

    if R <= rows_cap:
        tile_rows = R                       # single full tile, never ragged
    else:
        # Prefer a divisor of R near the cap so the ragged mask compiles away.
        tile_rows = 0
        lo = max(row_align, (rows_cap // 2 // row_align) * row_align)
        for cand in range(rows_cap, lo - 1, -row_align):
            if R % cand == 0:
                tile_rows = cand
                break
        if tile_rows == 0:
            tile_rows = rows_cap
    n_row_tiles = -(-R // tile_rows)

    # v7x dual-TC: if the batch alone can't feed both cores, split the
    # row-tile axis into a leading "parallel" axis with per-split partials.
    n_splits = 2 if (N == 1 and n_row_tiles >= 2) else 1
    tiles_per_split = -(-n_row_tiles // n_splits)
    mask_needed = (R % tile_rows != 0) or (n_splits * tiles_per_split != n_row_tiles)

    out_rows = ((C + 2 + 7) // 8) * 8       # inter rows + psum + tsum, 8-aligned

    def x_map(s, n, r):
        g = jnp.minimum(s * tiles_per_split + r, n_row_tiles - 1)
        return (n, 0, g, 0)

    def t_map(s, n, r):
        g = jnp.minimum(s * tiles_per_split + r, n_row_tiles - 1)
        return (n, g, 0)

    def o_map(s, n, r):
        return (s, n, 0, 0)

    kernel = functools.partial(
        _dice_kernel, num_classes=C, ignore_index=ignore_index,
        tile_rows=tile_rows, rows_total=R, tiles_per_split=tiles_per_split,
        out_rows=out_rows, mask_needed=mask_needed)

    partials = pl.pallas_call(
        kernel,
        out_shape=jax.ShapeDtypeStruct((n_splits, N, out_rows, _LANES),
                                       jnp.float32),
        grid_spec=pltpu.PrefetchScalarGridSpec(
            num_scalar_prefetch=0,
            grid=(n_splits, N, tiles_per_split),
            in_specs=[
                pl.BlockSpec((None, C, tile_rows, _LANES), x_map),
                pl.BlockSpec((None, tile_rows, _LANES), t_map),
            ],
            out_specs=pl.BlockSpec((None, None, out_rows, _LANES), o_map)),
        compiler_params=pltpu.CompilerParams(
            dimension_semantics=("parallel", "parallel", "arbitrary"),
            vmem_limit_bytes=vmem_limit),
    )(x, t)

    # Final cross-lane / cross-split / cross-batch reduce + dice math: tiny.
    sums = jnp.sum(partials, axis=(0, 1, 3))            # (out_rows,)
    inter = sums[:C]
    psum = sums[C]
    tsum = sums[C + 1]
    dice = (2.0 * inter + smooth) / (psum + tsum + smooth)
    return jnp.mean(1.0 - dice)


def dice_loss_ref(logits_nchw, target_nhw, *, ignore_index=255, smooth=1.0):
    """Pure-JAX reference mirroring the PyTorch forward exactly."""
    N, C, H, W = logits_nchw.shape
    x = jnp.transpose(logits_nchw, (0, 2, 3, 1)).reshape(-1, C).astype(jnp.float32)
    t = target_nhw.reshape(-1)
    valid = (t != ignore_index).astype(jnp.float32)
    p = jax.nn.softmax(x, axis=1)
    psum = jnp.sum(p * valid[:, None])
    tsum = jnp.sum(t.astype(jnp.float32) * valid)
    losses = []
    for c in range(C):
        tc = (t == c).astype(jnp.float32) * valid
        inter = jnp.sum(p[:, c] * tc)
        dice = (2.0 * inter + smooth) / (psum + tsum + smooth)
        losses.append(1.0 - dice)
    return jnp.mean(jnp.stack(losses))


if __name__ == "__main__":
    # --- Main check: shapes implied by the module spec ----------------------
    k1, k2, k3 = jax.random.split(jax.random.PRNGKey(0), 3)
    N, C, H, W = 2, 4, 16, 16
    logits = jax.random.normal(k1, (N, C, H, W), dtype=jnp.float32)
    target = jax.random.randint(k2, (N, H, W), 0, C, dtype=jnp.int32)
    target = jnp.where(jax.random.bernoulli(k3, 0.1, (N, H, W)),
                       jnp.int32(255), target)

    loss = dice_loss_pallas(logits, target, ignore_index=255, smooth=1.0)
    jax.block_until_ready(loss)
    loss_ref = dice_loss_ref(logits, target, ignore_index=255, smooth=1.0)
    assert jnp.allclose(loss, loss_ref, rtol=1e-5, atol=1e-6), (loss, loss_ref)

    # --- Secondary check: N=1 dual-TC split axis, ragged last tile, clamped
    #     padded tile and lane padding (small forced tiles) -------------------
    k4, k5, k6 = jax.random.split(jax.random.PRNGKey(1), 3)
    logits2 = jax.random.normal(k4, (1, 5, 52, 52), dtype=jnp.float32)
    target2 = jax.random.randint(k5, (1, 52, 52), 0, 5, dtype=jnp.int32)
    target2 = jnp.where(jax.random.bernoulli(k6, 0.15, (1, 52, 52)),
                        jnp.int32(255), target2)
    loss2 = dice_loss_pallas(logits2, target2, max_tile_pixels=1024)
    jax.block_until_ready(loss2)
    loss2_ref = dice_loss_ref(logits2, target2)
    assert jnp.allclose(loss2, loss2_ref, rtol=1e-5, atol=1e-6), (loss2, loss2_ref)

    # --- Secondary check: native narrow (uint8) targets, no wrapper cast -----
    k7, k8, k9 = jax.random.split(jax.random.PRNGKey(2), 3)
    logits3 = jax.random.normal(k7, (1, 3, 60, 60), dtype=jnp.float32)
    target3 = jax.random.randint(k8, (1, 60, 60), 0, 3, dtype=jnp.int32)
    target3 = jnp.where(jax.random.bernoulli(k9, 0.1, (1, 60, 60)),
                        jnp.int32(255), target3).astype(jnp.uint8)
    loss3 = dice_loss_pallas(logits3, target3, max_tile_pixels=1024)
    jax.block_until_ready(loss3)
    loss3_ref = dice_loss_ref(logits3, target3)
    assert jnp.allclose(loss3, loss3_ref, rtol=1e-5, atol=1e-6), (loss3, loss3_ref)

    print("KERNEL_OK")
</pallas_src>

<mosaic_0001>
module attributes {stable_mosaic.version = 11 : i64} {
  func.func @_dice_kernel(%arg0: i32, %arg1: i32, %arg2: i32, %arg3: memref<1x4x2x128xf32, #tpu.memory_space<vmem>>, %arg4: memref<1x2x128xi32, #tpu.memory_space<vmem>>, %arg5: memref<1x1x8x128xf32, #tpu.memory_space<vmem>>) attributes {dimension_semantics = [#tpu.dimension_semantics<parallel>, #tpu.dimension_semantics<parallel>, #tpu.dimension_semantics<arbitrary>], iteration_bounds = array<i64: 1, 2, 1>, scalar_prefetch = 0 : i64, scratch_operands = 0 : i64, tpu.core_type = #tpu.core_type<tc>, window_params = [{transform_indices = @transform_0, window_bounds = array<i64: 1, 4, 2, 128>}, {transform_indices = @transform_1, window_bounds = array<i64: 1, 2, 128>}, {transform_indices = @transform_2, window_bounds = array<i64: 1, 1, 8, 128>}]} {
    %c0_i32 = arith.constant 0 : i32
    %0 = arith.cmpi eq, %arg2, %c0_i32 : i32
    %1 = arith.extui %0 : i1 to i32
    %c0_i32_0 = arith.constant 0 : i32
    %2 = arith.cmpi ne, %1, %c0_i32_0 : i32
    scf.if %2 {
      %cst_27 = arith.constant 0.000000e+00 : f32
      %103 = vector.broadcast %cst_27 : f32 to vector<8x128xf32>
      %c0_28 = arith.constant 0 : index
      %c0_29 = arith.constant 0 : index
      %c0_30 = arith.constant 0 : index
      %c0_31 = arith.constant 0 : index
      %104 = vector.load %arg5[%c0_28, %c0_29, %c0_30, %c0_31] : memref<1x1x8x128xf32, #tpu.memory_space<vmem>>, vector<1x1x8x128xf32>
      %105 = vector.shape_cast %104 : vector<1x1x8x128xf32> to vector<8x128xf32>
      %106 = vector.shape_cast %103 : vector<8x128xf32> to vector<1x1x8x128xf32>
      tpu.vector_store %arg5[%c0_28, %c0_29, %c0_30, %c0_31], %106 {strides = array<i32>} : memref<1x1x8x128xf32, #tpu.memory_space<vmem>>, vector<1x1x8x128xf32>,
    } else {
    }
    %c0 = arith.constant 0 : index
    %c0_1 = arith.constant 0 : index
    %c0_2 = arith.constant 0 : index
    %c0_3 = arith.constant 0 : index
    %3 = vector.load %arg3[%c0, %c0_1, %c0_2, %c0_3] : memref<1x4x2x128xf32, #tpu.memory_space<vmem>>, vector<1x4x2x128xf32>
    %4 = vector.shape_cast %3 : vector<1x4x2x128xf32> to vector<4x2x128xf32>
    %c0_4 = arith.constant 0 : index
    %c0_5 = arith.constant 0 : index
    %c0_6 = arith.constant 0 : index
    %5 = vector.load %arg4[%c0_4, %c0_5, %c0_6] : memref<1x2x128xi32, #tpu.memory_space<vmem>>, vector<1x2x128xi32>
    %6 = vector.shape_cast %5 : vector<1x2x128xi32> to vector<2x128xi32>
    %c255_i32 = arith.constant 255 : i32
    %7 = vector.broadcast %c255_i32 : i32 to vector<2x128xi32>
    %8 = arith.cmpi ne, %6, %7 : vector<2x128xi32>
    %9 = arith.extui %8 : vector<2x128xi1> to vector<2x128xi32>
    %10 = arith.sitofp %9 : vector<2x128xi32> to vector<2x128xf32>
    %c-1_i32 = arith.constant -1 : i32
    %11 = vector.broadcast %c-1_i32 : i32 to vector<2x128xi32>
    %12 = arith.select %8, %6, %11 : vector<2x128xi1>, vector<2x128xi32>
    %13 = vector.extract_strided_slice %4 {offsets = [0, 0, 0], sizes = [1, 2, 128], strides = [1, 1, 1]} : vector<4x2x128xf32> to vector<1x2x128xf32>
    %14 = vector.shape_cast %13 : vector<1x2x128xf32> to vector<2x128xf32>
    %15 = vector.extract_strided_slice %4 {offsets = [1, 0, 0], sizes = [1, 2, 128], strides = [1, 1, 1]} : vector<4x2x128xf32> to vector<1x2x128xf32>
    %16 = vector.shape_cast %15 : vector<1x2x128xf32> to vector<2x128xf32>
    %17 = arith.maximumf %14, %16 : vector<2x128xf32>
    %18 = vector.extract_strided_slice %4 {offsets = [2, 0, 0], sizes = [1, 2, 128], strides = [1, 1, 1]} : vector<4x2x128xf32> to vector<1x2x128xf32>
    %19 = vector.shape_cast %18 : vector<1x2x128xf32> to vector<2x128xf32>
    %20 = arith.maximumf %17, %19 : vector<2x128xf32>
    %21 = vector.extract_strided_slice %4 {offsets = [3, 0, 0], sizes = [1, 2, 128], strides = [1, 1, 1]} : vector<4x2x128xf32> to vector<1x2x128xf32>
    %22 = vector.shape_cast %21 : vector<1x2x128xf32> to vector<2x128xf32>
    %23 = arith.maximumf %20, %22 : vector<2x128xf32>
    %24 = vector.extract_strided_slice %4 {offsets = [0, 0, 0], sizes = [1, 2, 128], strides = [1, 1, 1]} : vector<4x2x128xf32> to vector<1x2x128xf32>
    %25 = vector.shape_cast %24 : vector<1x2x128xf32> to vector<2x128xf32>
    %26 = arith.subf %25, %23 : vector<2x128xf32>
    %27 = math.exp %26 : vector<2x128xf32>
    %28 = vector.extract_strided_slice %4 {offsets = [1, 0, 0], sizes = [1, 2, 128], strides = [1, 1, 1]} : vector<4x2x128xf32> to vector<1x2x128xf32>
    %29 = vector.shape_cast %28 : vector<1x2x128xf32> to vector<2x128xf32>
    %30 = arith.subf %29, %23 : vector<2x128xf32>
    %31 = math.exp %30 : vector<2x128xf32>
    %32 = arith.addf %27, %31 : vector<2x128xf32>
    %33 = vector.extract_strided_slice %4 {offsets = [2, 0, 0], sizes = [1, 2, 128], strides = [1, 1, 1]} : vector<4x2x128xf32> to vector<1x2x128xf32>
    %34 = vector.shape_cast %33 : vector<1x2x128xf32> to vector<2x128xf32>
    %35 = arith.subf %34, %23 : vector<2x128xf32>
    %36 = math.exp %35 : vector<2x128xf32>
    %37 = arith.addf %32, %36 : vector<2x128xf32>
    %38 = vector.extract_strided_slice %4 {offsets = [3, 0, 0], sizes = [1, 2, 128], strides = [1, 1, 1]} : vector<4x2x128xf32> to vector<1x2x128xf32>
    %39 = vector.shape_cast %38 : vector<1x2x128xf32> to vector<2x128xf32>
    %40 = arith.subf %39, %23 : vector<2x128xf32>
    %41 = math.exp %40 : vector<2x128xf32>
    %42 = arith.addf %37, %41 : vector<2x128xf32>
    %cst = arith.constant 1.000000e+00 : f32
    %43 = vector.broadcast %cst : f32 to vector<2x128xf32>
    %44 = arith.divf %43, %42 : vector<2x128xf32>
    %45 = vector.extract_strided_slice %4 {offsets = [0, 0, 0], sizes = [1, 2, 128], strides = [1, 1, 1]} : vector<4x2x128xf32> to vector<1x2x128xf32>
    %46 = vector.shape_cast %45 : vector<1x2x128xf32> to vector<2x128xf32>
    %47 = arith.subf %46, %23 : vector<2x128xf32>
    %48 = math.exp %47 : vector<2x128xf32>
    %49 = arith.mulf %48, %44 : vector<2x128xf32>
    %c0_i32_7 = arith.constant 0 : i32
    %50 = vector.broadcast %c0_i32_7 : i32 to vector<2x128xi32>
    %51 = arith.cmpi eq, %12, %50 : vector<2x128xi32>
    %cst_8 = arith.constant 0.000000e+00 : f32
    %52 = vector.broadcast %cst_8 : f32 to vector<2x128xf32>
    %53 = arith.select %51, %49, %52 : vector<2x128xi1>, vector<2x128xf32>
    %cst_9 = arith.constant dense<0.000000e+00> : vector<128xf32>
    %54 = vector.multi_reduction <add>, %53, %cst_9 [0] : vector<2x128xf32> to vector<128xf32>
    %55 = vector.shape_cast %54 : vector<128xf32> to vector<1x128xf32>
    %56 = vector.extract_strided_slice %4 {offsets = [1, 0, 0], sizes = [1, 2, 128], strides = [1, 1, 1]} : vector<4x2x128xf32> to vector<1x2x128xf32>
    %57 = vector.shape_cast %56 : vector<1x2x128xf32> to vector<2x128xf32>
    %58 = arith.subf %57, %23 : vector<2x128xf32>
    %59 = math.exp %58 : vector<2x128xf32>
    %60 = arith.mulf %59, %44 : vector<2x128xf32>
    %c1_i32 = arith.constant 1 : i32
    %61 = vector.broadcast %c1_i32 : i32 to vector<2x128xi32>
    %62 = arith.cmpi eq, %12, %61 : vector<2x128xi32>
    %cst_10 = arith.constant 0.000000e+00 : f32
    %63 = vector.broadcast %cst_10 : f32 to vector<2x128xf32>
    %64 = arith.select %62, %60, %63 : vector<2x128xi1>, vector<2x128xf32>
    %cst_11 = arith.constant dense<0.000000e+00> : vector<128xf32>
    %65 = vector.multi_reduction <add>, %64, %cst_11 [0] : vector<2x128xf32> to vector<128xf32>
    %66 = vector.shape_cast %65 : vector<128xf32> to vector<1x128xf32>
    %67 = vector.extract_strided_slice %4 {offsets = [2, 0, 0], sizes = [1, 2, 128], strides = [1, 1, 1]} : vector<4x2x128xf32> to vector<1x2x128xf32>
    %68 = vector.shape_cast %67 : vector<1x2x128xf32> to vector<2x128xf32>
    %69 = arith.subf %68, %23 : vector<2x128xf32>
    %70 = math.exp %69 : vector<2x128xf32>
    %71 = arith.mulf %70, %44 : vector<2x128xf32>
    %c2_i32 = arith.constant 2 : i32
    %72 = vector.broadcast %c2_i32 : i32 to vector<2x128xi32>
    %73 = arith.cmpi eq, %12, %72 : vector<2x128xi32>
    %cst_12 = arith.constant 0.000000e+00 : f32
    %74 = vector.broadcast %cst_12 : f32 to vector<2x128xf32>
    %75 = arith.select %73, %71, %74 : vector<2x128xi1>, vector<2x128xf32>
    %cst_13 = arith.constant dense<0.000000e+00> : vector<128xf32>
    %76 = vector.multi_reduction <add>, %75, %cst_13 [0] : vector<2x128xf32> to vector<128xf32>
    %77 = vector.shape_cast %76 : vector<128xf32> to vector<1x128xf32>
    %78 = vector.extract_strided_slice %4 {offsets = [3, 0, 0], sizes = [1, 2, 128], strides = [1, 1, 1]} : vector<4x2x128xf32> to vector<1x2x128xf32>
    %79 = vector.shape_cast %78 : vector<1x2x128xf32> to vector<2x128xf32>
    %80 = arith.subf %79, %23 : vector<2x128xf32>
    %81 = math.exp %80 : vector<2x128xf32>
    %82 = arith.mulf %81, %44 : vector<2x128xf32>
    %c3_i32 = arith.constant 3 : i32
    %83 = vector.broadcast %c3_i32 : i32 to vector<2x128xi32>
    %84 = arith.cmpi eq, %12, %83 : vector<2x128xi32>
    %cst_14 = arith.constant 0.000000e+00 : f32
    %85 = vector.broadcast %cst_14 : f32 to vector<2x128xf32>
    %86 = arith.select %84, %82, %85 : vector<2x128xi1>, vector<2x128xf32>
    %cst_15 = arith.constant dense<0.000000e+00> : vector<128xf32>
    %87 = vector.multi_reduction <add>, %86, %cst_15 [0] : vector<2x128xf32> to vector<128xf32>
    %88 = vector.shape_cast %87 : vector<128xf32> to vector<1x128xf32>
    %cst_16 = arith.constant dense<0.000000e+00> : vector<128xf32>
    %89 = vector.multi_reduction <add>, %10, %cst_16 [0] : vector<2x128xf32> to vector<128xf32>
    %90 = vector.shape_cast %89 : vector<128xf32> to vector<1x128xf32>
    %91 = arith.sitofp %6 : vector<2x128xi32> to vector<2x128xf32>
    %92 = arith.mulf %91, %10 : vector<2x128xf32>
    %cst_17 = arith.constant dense<0.000000e+00> : vector<128xf32>
    %93 = vector.multi_reduction <add>, %92, %cst_17 [0] : vector<2x128xf32> to vector<128xf32>
    %94 = vector.shape_cast %93 : vector<128xf32> to vector<1x128xf32>
    %cst_18 = arith.constant 0.000000e+00 : f32
    %95 = vector.broadcast %cst_18 : f32 to vector<2x128xf32>
    %c0_19 = arith.constant 0 : index
    %c0_20 = arith.constant 0 : index
    %c0_21 = arith.constant 0 : index
    %c0_22 = arith.constant 0 : index
    %96 = vector.load %arg5[%c0_19, %c0_20, %c0_21, %c0_22] : memref<1x1x8x128xf32, #tpu.memory_space<vmem>>, vector<1x1x8x128xf32>
    %97 = vector.shape_cast %96 : vector<1x1x8x128xf32> to vector<8x128xf32>
    %98 = tpu.concatenate %55, %66, %77, %88, %90, %94, %95 in 0 : vector<1x128xf32>, vector<1x128xf32>, vector<1x128xf32>, vector<1x128xf32>, vector<1x128xf32>, vector<1x128xf32>, vector<2x128xf32> -> vector<8x128xf32>
    %99 = arith.addf %97, %98 : vector<8x128xf32>
    %c0_23 = arith.constant 0 : index
    %c0_24 = arith.constant 0 : index
    %c0_25 = arith.constant 0 : index
    %c0_26 = arith.constant 0 : index
    %100 = vector.load %arg5[%c0_23, %c0_24, %c0_25, %c0_26] : memref<1x1x8x128xf32, #tpu.memory_space<vmem>>, vector<1x1x8x128xf32>
    %101 = vector.shape_cast %100 : vector<1x1x8x128xf32> to vector<8x128xf32>
    %102 = vector.shape_cast %99 : vector<8x128xf32> to vector<1x1x8x128xf32>
    tpu.vector_store %arg5[%c0_23, %c0_24, %c0_25, %c0_26], %102 {strides = array<i32>} : memref<1x1x8x128xf32, #tpu.memory_space<vmem>>, vector<1x1x8x128xf32>,
    return
  }
  func.func @transform_0(%arg0: i32, %arg1: i32, %arg2: i32) -> (i32, i32, i32, i32) {
    %c1_i32 = arith.constant 1 : i32
    %0 = arith.muli %arg0, %c1_i32 : i32
    %1 = arith.addi %0, %arg2 : i32
    %c0_i32 = arith.constant 0 : i32
    %2 = arith.minsi %1, %c0_i32 : i32
    %c0_i32_0 = arith.constant 0 : i32
    %c0_i32_1 = arith.constant 0 : i32
    %c0_i32_2 = arith.constant 0 : i32
    return %arg1, %c0_i32_0, %2, %c0_i32_1 : i32, i32, i32, i32
  }
  func.func @transform_1(%arg0: i32, %arg1: i32, %arg2: i32) -> (i32, i32, i32) {
    %c1_i32 = arith.constant 1 : i32
    %0 = arith.muli %arg0, %c1_i32 : i32
    %1 = arith.addi %0, %arg2 : i32
    %c0_i32 = arith.constant 0 : i32
    %2 = arith.minsi %1, %c0_i32 : i32
    %c0_i32_0 = arith.constant 0 : i32
    %c0_i32_1 = arith.constant 0 : i32
    return %arg1, %2, %c0_i32_0 : i32, i32, i32
  }
  func.func @transform_2(%arg0: i32, %arg1: i32, %arg2: i32) -> (i32, i32, i32, i32) {
    %c0_i32 = arith.constant 0 : i32
    %c0_i32_0 = arith.constant 0 : i32
    %c0_i32_1 = arith.constant 0 : i32
    return %arg0, %arg1, %c0_i32, %c0_i32_0 : i32, i32, i32, i32
  }
}

</mosaic_0001>

<bundles_post_ra>
// kernel: tpu_custom_call.1
= control target key start
LH: loop header
LB: loop body
LE: loop exit
PB: predicated region body
PF: predicated region fallthrough
CT: control target
= control target key end

     0   :  { %7 = vsyncpa [#allocation3], 0  ;;  %s915_s0 = inlined_call_operand.hbm [shape: f32[2,4,2,128], index: 0, kind: input, shape index: {}]   ;;  %s916_s1 = inlined_call_operand.hbm [shape: s32[2,2,128], index: 1, kind: input, shape index: {}]   ;;  %s917_s2 = inlined_call_operand.hbm [shape: f32[1,2,8,128], index: 2, kind: output, shape index: {}]  }
   0x1   :  { %9 = vsyncpa [#allocation3 + $0x1], 0 }
   0x2   :  { %10 = vsyncpa [#allocation6], 0 }
   0x3   :  { %12 = vsyncpa [#allocation6 + $0x1], 0 }
   0x4   :  { %13 = vsyncpa [#allocation4], 0 }
   0x5   :  { %15 = vsyncpa [#allocation4 + $0x1], 0  ;;  %s764_s9 = smov 0   ;;  %s766_s10 = smov 0  }
   0x6   :  { %s768_s11 = smov 0   ;;  %s770_s12 = smov 0  }
   0x7   :  { %s772_s13 = smov 0   ;;  %s774_s14 = smov 0  }
   0x8 LB: > { %s499_s15 = sadd.s32 4294967295, %s744_s14   ;;  %s500_s16 = sadd.s32 4294967294, %s744_s14   ;;  %s744_s14 = sphi %s774_s14, %s21_s14   ;;  %s740_s13 = sphi %s772_s13, %s927_s13   ;;  %s736_s12 = sphi %s770_s12, %s926_s12   ;;  %s732_s11 = sphi %s768_s11, %s925_s11   ;;  %s728_s10 = sphi %s766_s10, %s924_s10   ;;  %s724_s9 = sphi %s764_s9, %s923_s9  }
   0x9   : > { %s36_s17 = sadd.s32 1, %s740_s13  ;;  %s55_s18 = sadd.s32 1, %s732_s11 }
   0xa   : > { %p38_p0 = scmp.ge.s32.totalorder %s36_s17, 2  ;;  %p62_p1 = scmp.ne.s32.totalorder %s732_s11, %s728_s10 }
   0xb   : > { %p63_p2 = scmp.eq.s32.totalorder %s744_s14, 0  ;;  %p68_p3 = scmp.ne.s32.totalorder %s728_s10, %s724_s9 }
   0xc   : > { %s929_s17 = smov (%p38_p0, %s36_s17), 0  ;;  %p69_p5 = scmp.eq.s32.totalorder %s499_s15, 0 }
   0xd   : > { %p805_p4 = por %p63_p2, %p62_p1  ;;  %s50_s20 = ssub.s32 %s740_s13, %s929_s17 }
   0xe   : > { %p128_p6 = scmp.eq.s32.totalorder %s499_s15, 1  ;;  %p53_p7 = scmp.eq.s32.totalorder %s50_s20, 0 }
   0xf   : > { %p811_p8 = por %p69_p5, %p68_p3  ;;  %p134_p10 = scmp.eq.s32.totalorder %s500_s16, 1 }
  0x10   : > { %p815_p9 = por %p128_p6, %p62_p1  ;;  %p502_p12 = scmp.ge.s32.totalorder %s744_s14, 2 }
  0x11   : > { %s820_s23 = scalar_select %p53_p7, %s732_s11, %s55_s18  }
  0x12   : > { %p822_p11 = por %p134_p10, %p68_p3  ;;  %p535_p13 = scmp.lt.s32.totalorder %s744_s14, 2 }
  0x13   : > { %s154_s25 = sand.u32 1, %s732_s11   ;;  %s517_s27 = sshll.u32 %s740_s13, 3 }
  0x14   : > { %s503_s26 = sshll.u32 %s154_s25, 3  ;;  %s167_s30 = scalar_lea.hbm %s915_s0, %s517_s27 }
  0x15   : > { %s158_s3 = scalar_lea.vmem [#allocation2], %s503_s26  ;;  %s168_s5 = sshll.u32 %s167_s30, 4  ;;  %s169_s5 = int_to_ptr.hbm [resolvable:$true] %s168_s5 }
  0x16   : > { %s170_s4 = sshll.u32 %s158_s3, 4  ;;  %p835_p0 = pnand %p535_p13, %p805_p4  ;;  %s171_s4 = int_to_ptr.vmem [resolvable:$true] %s170_s4 }
  0x17   : > { %p508_p1 = scmp.ge.s32.totalorder %s744_s14, 1  ;;  %s155_s7 = scalar_lea.sflag [#allocation3], %s154_s25 }
  0x18   : > { %s746_s8 = smov 32   ;;  %s747_s15 = smov 2  }
  0x19   : > { %527 = dma.hbm_to_vmem [thread:$0]  (!%p835_p0), %s169_s5, 128, %s171_s4, %s155_s7, %s746_s8, %s746_s8, %s747_s15  }
  0x1a   : > { %p201_p2 = scmp.lt.s32.totalorder %s744_s14, 3  ;;  %s506_s16 = sshll.u32 %s154_s25, 1 }
  0x1b   : > { %s507_s18 = sshll.u32 %s740_s13, 1  ;;  %s184_s27 = scalar_lea.vmem [#allocation5], %s506_s16 }
  0x1c   : > { %p202_p3 = pnand %p508_p1, %p201_p2  ;;  %s192_s19 = scalar_lea.hbm %s916_s1, %s507_s18 }
  0x1d   : > { %s196_s28 = sshll.u32 %s184_s27, 4  ;;  %s194_s29 = sshll.u32 %s192_s19, 4  ;;  %s197_s28 = int_to_ptr.vmem [resolvable:$true] %s196_s28  ;;  %s195_s29 = int_to_ptr.hbm [resolvable:$true] %s194_s29 }
  0x1e   : > { %s181_s30 = scalar_lea.sflag [#allocation6], %s154_s25  ;;  %205 = sbr.rel (%p202_p3) target bundleno = 106 (0x6a), region = 28 }
  0x1f   : > { %530 = dma.hbm_to_vmem [thread:$0]  (!%p835_p0), %s195_s29, 32, %s197_s28, %s181_s30  }
  0x20   : > { %s850_s3 = sand.u32 (!%p202_p3), 1, %s728_s10  }
  0x21   : > { %s509_s4 = sshll.u32 (!%p202_p3), %s850_s3, 3  ;;  %s208_s5 = scalar_lea.sflag (!%p202_p3), [#allocation3], %s850_s3 }
  0x22   : > { %s211_s7 = scalar_lea.vmem (!%p202_p3), [#allocation2], %s509_s4 }
  0x23   : > { %711 = dma.done.wait (%p811_p8), %s208_s5, 128  }
  0x24   : > { %713 = vsyncadd (%p811_p8), %s208_s5, 4294967168  ;;  %s510_s25 = sshll.u32 %s850_s3, 1  ;;  %s218_s6 = scalar_lea.sflag [#allocation6], %s850_s3 }
  0x25   : > { %s221_s8 = scalar_lea.vmem [#allocation5], %s510_s25 }
  0x26   : > { %715 = dma.done.wait (%p811_p8), %s218_s6, 32  }
  0x27   : > { %717 = vsyncadd (%p811_p8), %s218_s6, 4294967264  ;;  %v259_v0 = vld [vmem:[%s211_s7] sm:$0x3]  ;;  %v260_v1 = vld [vmem:[%s211_s7 + $0x2] sm:$0x3]  ;;  %v748_v24 = vmov 0.0  }
  0x28   : > { %v261_v2 = vld [vmem:[%s211_s7 + $0x4] sm:$0x3]  ;;  %v268_v3 = vmax.f32 %v259_v0, %v260_v1  ;;  %v262_v4 = vld [vmem:[%s211_s7 + $0x6] sm:$0x3]  ;;  %v263_v20 = vld [vmem:[%s221_s8] sm:$0x3] }
  0x29   : > { %vm264_vm0 = vcmp.ne.s32.totalorder %v263_v20, 255  ;;  %v349_v23 = vcvt.s32.f32 %v263_v20  ;;  %vm304_vm1 = vcmask 1041408   ;;  %vm359_vm10 = vcmask 1040384   ;;  %s514_s21 = sshll.u32 %s736_s12, 3  ;;  %s247_s12 = scalar_lea.vmem [#allocation7], %s509_s4 }
  0x2a   : > { %v269_v5 = vmax.f32 %v268_v3, %v261_v2  ;;  %v512_v25 = vsel %vm264_vm0, 1.0, %v748_v24  ;;  %v267_v37 = vsel %vm264_vm0, %v263_v20, 4294967295  ;;  %vm362_vm11 = vcmask 1042432   ;;  %s385_s18 = scalar_lea.hbm %s917_s2, %s514_s21  ;;  %s387_s20 = sshll.u32 %s247_s12, 4  ;;  %s388_s20 = int_to_ptr.vmem [resolvable:$true] %s387_s20 }
  0x2b   : > { %v350_v26 = vmul.f32 %v512_v25, %v349_v23  ;;  %v342_v29 = vsel %vm304_vm1, %v512_v25, 0.0  ;;  %vm302_vm6 = vcmp.eq.s32.totalorder %v267_v37, 0  ;;  %vm313_vm7 = vcmp.eq.s32.totalorder %v267_v37, 1  ;;  %s389_s26 = sshll.u32 %s385_s18, 4  ;;  %s373_s19 = scalar_lea.sflag [#allocation4], %s850_s3  ;;  %s390_s26 = int_to_ptr.hbm [resolvable:$true] %s389_s26 }
  0x2c   : > { %v270_v6 = vmax.f32 %v269_v5, %v262_v4  ;;  %v343_v34 = vrot.slane %v342_v29, 4  ;;  %vm323_vm8 = vcmp.eq.s32.totalorder %v267_v37, 2  ;;  %vm333_vm9 = vcmp.eq.s32.totalorder %v267_v37, 3  ;;  %s672_s27 = sshra.s32 %s390_s26, 4  ;;  %s678_s5 = scalar_lea.hbm %s917_s2, 16  ;;  %s673_s27 = int_to_ptr.hbm [resolvable:$true] %s672_s27 }
  0x2d   : > { %v351_v30 = vsel %vm304_vm1, %v350_v26, 0.0  ;;  %vm364_vm12 = vcmask 1043456   ;;  %vm366_vm13 = vcmask 1044480   ;;  %vm368_vm14 = vcmask 1045504   ;;  %s674_s28 = scalar_lea.hbm %s673_s27, 8  ;;  %p679_p7 = scmp.lt.s32.totalorder %s673_s27, %s917_s2 }
  0x2e   : > { %v271_v7 = vsub.f32 %v259_v0, %v270_v6  ;;  %v274_v8 = vsub.f32 %v260_v1, %v270_v6  ;;  %v278_v9 = vsub.f32 %v261_v2, %v270_v6  ;;  %v282_v10 = vsub.f32 %v262_v4, %v270_v6  ;;  %p675_p4 = scmp.ne.s32.totalorder %s673_s27, %s674_s28  ;;  %p680_p8 = scmp.lt.s32.totalorder %s678_s5, %s674_s28 }
  0x2f   : > { %v352_v35 = vrot.slane %v351_v30, 4  ;;  %v344_v40 = vadd.f32 %v343_v34, %v342_v29 }
  0x30   : > { %v272_v11 = vmul.f32 1.442695, %v271_v7  ;;  %v275_v12 = vmul.f32 1.442695, %v274_v8  ;;  %v279_v13 = vmul.f32 1.442695, %v278_v9  ;;  %p676_p5 = pnand %p675_p4, %p815_p9  ;;  %p681_p10 = por %p680_p8, %p679_p7 }
  0x31   : > { %v283_v14 = vmul.f32 1.442695, %v282_v10  ;;  %v353_v41 = vadd.f32 %v352_v35, %v351_v30  ;;  %v345_v48 = vrot.slane %v344_v40, 2 }
  0x32   : > { %588 = vpow2.f32 %v272_v11  ;;  %p677_p6 = pneg %p676_p5 }
  0x33   : > { %590 = vpow2.f32 %v275_v12  ;;  %v354_v49 = vrot.slane %v353_v41, 2  ;;  %v346_v2 = vadd.f32 %v345_v48, %v344_v40 }
  0x34   : > { %592 = vpow2.f32 %v279_v13  ;;  %p682_p13 = pnand %p681_p10, %p677_p6 }
  0x35   : > { %594 = vpow2.f32 %v283_v14  ;;  %v355_v3 = vadd.f32 %v354_v49, %v353_v41  ;;  %v347_v12 = vrot.slane %v346_v2, 1 }
  0x37   : > { %v356_v13 = vrot.slane %v355_v3, 1 }
  0x38   : > { %v589_v15 = vpop.eup %588 }
  0x39   : > { %v591_v16 = vpop.eup %590  ;;  %v357_v23 = vadd.f32 %v356_v13, %v355_v3 }
  0x3a   : > { %v593_v17 = vpop.eup %592  ;;  %v277_v18 = vadd.f32 %v591_v16, %v589_v15 }
  0x3b   : > { %v595_v19 = vpop.eup %594 }
  0x3c   : > { %v281_v21 = vadd.f32 %v593_v17, %v277_v18 }
  0x3e   : > { %v285_v22 = vadd.f32 %v595_v19, %v281_v21 }
  0x40   : > { %596 = vrcp.f32 %v285_v22  ;;  %v297_v31 = vand.u32 2147483648, %v285_v22  ;;  %vm291_vm2 = vweird.f32 %v285_v22  ;;  %v295_v33 = vand.u32 2147483647, %v285_v22 }
  0x42   : > { %v298_v38 = vor.u32 1.1754944e-38, %v297_v31  ;;  %vm296_vm5 = vcmp.eq.f32.partialorder %v295_v33, 8.507059e+37 }
  0x46   : > { %v597_v27 = vpop.eup %596 }
  0x47   : > { %v287_v28 = vmul.f32 %v597_v27, %v285_v22  ;;  %vm292_vm3 = vweird.f32 %v597_v27  ;;  %v348_v22 = vadd.f32 %v347_v12, %v346_v2 }
  0x48   : > { %vm293_vm4 = vmor %vm291_vm2, %vm292_vm3 }
  0x49   : > { %v288_v32 = vsub.f32 1.0, %v287_v28 }
  0x4b   : > { %v289_v36 = vmul.f32 %v597_v27, %v288_v32 }
  0x4d   : > { %v290_v39 = vadd.f32 %v597_v27, %v289_v36 }
  0x4f   : > { %v294_v42 = vsel %vm293_vm4, %v597_v27, %v290_v39 }
  0x50   : > { %v299_v43 = vsel %vm296_vm5, %v298_v38, %v294_v42 }
  0x51   : > { %v301_v44 = vmul.f32 %v589_v15, %v299_v43  ;;  %v312_v45 = vmul.f32 %v591_v16, %v299_v43  ;;  %v322_v46 = vmul.f32 %v593_v17, %v299_v43  ;;  %v332_v47 = vmul.f32 %v595_v19, %v299_v43 }
  0x53   : > { %v303_v50 = vsel %vm302_vm6, %v301_v44, 0.0  ;;  %v314_v51 = vsel %vm313_vm7, %v312_v45, 0.0  ;;  %v324_v52 = vsel %vm323_vm8, %v322_v46, 0.0  ;;  %v334_v53 = vsel %vm333_vm9, %v332_v47, 0.0 }
  0x54   : > { %v305_v54 = vsel %vm304_vm1, %v303_v50, 0.0  ;;  %v315_v55 = vsel %vm304_vm1, %v314_v51, 0.0  ;;  %v325_v56 = vsel %vm304_vm1, %v324_v52, 0.0  ;;  %v335_v57 = vsel %vm304_vm1, %v334_v53, 0.0 }
  0x55   : > { %v306_v58 = vrot.slane %v305_v54, 4  ;;  %v316_v59 = vrot.slane %v315_v55, 4  ;;  %v326_v60 = vrot.slane %v325_v56, 4  ;;  %v336_v61 = vrot.slane %v335_v57, 4 }
  0x57   : > { %v307_v62 = vadd.f32 %v306_v58, %v305_v54  ;;  %v317_v63 = vadd.f32 %v316_v59, %v315_v55  ;;  %v327_v0 = vadd.f32 %v326_v60, %v325_v56  ;;  %v337_v1 = vadd.f32 %v336_v61, %v335_v57 }
  0x59   : > { %v308_v4 = vrot.slane %v307_v62, 2  ;;  %v318_v5 = vrot.slane %v317_v63, 2  ;;  %v328_v6 = vrot.slane %v327_v0, 2  ;;  %v338_v7 = vrot.slane %v337_v1, 2 }
  0x5b   : > { %v309_v8 = vadd.f32 %v308_v4, %v307_v62  ;;  %v319_v9 = vadd.f32 %v318_v5, %v317_v63  ;;  %v329_v10 = vadd.f32 %v328_v6, %v327_v0  ;;  %v339_v11 = vadd.f32 %v338_v7, %v337_v1 }
  0x5d   : > { %v310_v14 = vrot.slane %v309_v8, 1  ;;  %v320_v15 = vrot.slane %v319_v9, 1  ;;  %v330_v16 = vrot.slane %v329_v10, 1  ;;  %v340_v17 = vrot.slane %v339_v11, 1 }
  0x5f   : > { %v311_v18 = vadd.f32 %v310_v14, %v309_v8  ;;  %v321_v19 = vadd.f32 %v320_v15, %v319_v9  ;;  %v331_v20 = vadd.f32 %v330_v16, %v329_v10  ;;  %v341_v21 = vadd.f32 %v340_v17, %v339_v11 }
  0x61   : > { %v360_v24 = vsel %vm359_vm10, %v311_v18, %v321_v19 }
  0x62   : > { %v361_v25 = vsel %vm304_vm1, %v360_v24, %v331_v20 }
  0x63   : > { %v363_v26 = vsel %vm362_vm11, %v361_v25, %v341_v21 }
  0x64   : > { %v365_v27 = vsel %vm364_vm12, %v363_v26, %v348_v22 }
  0x65   : > { %v367_v28 = vsel %vm366_vm13, %v365_v27, %v357_v23 }
  0x66   : > { %v369_v29 = vsel %vm368_vm14, %v367_v28, 0.0 }
  0x67   : > { %371 = vst [vmem:[%s247_s12] sm:$0xff] %v369_v29 }
  0x68   : > { %685 = shalt.err (!%p682_p13)
}
  0x69   : > { %522 = dma.vmem_to_hbm [thread:$0]  (%p815_p9), %s388_s20, 128, %s390_s26, %s373_s19  }
  0x6a PF: > { %s401_s3 = sand.u32 1, %s724_s9   ;;  %p532_p0 = pnand %p502_p12, %p822_p11 }
  0x6b   : > { %s402_s25 = scalar_lea.sflag [#allocation4], %s401_s3 }
  0x6c   : > { %p533_p1 = pneg %p532_p0 }
  0x6e   : > { %719 = dma.done.wait (%p533_p1), %s402_s25, 128  }
  0x6f   : > { %721 = vsyncadd (%p533_p1), %s402_s25, 4294967168  ;;  %s21_s14 = sadd.s32 1, %s744_s14   ;;  %s923_s9 = smov %s728_s10 }
  0x70   : > { %p18_p2 = scmp.ge.s32.totalorder %s21_s14, 4   ;;  %s924_s10 = smov %s732_s11 }
  0x71   : > { %s925_s11 = smov %s820_s23  ;;  %s926_s12 = smov %s740_s13 }
  0x72   : > { %s927_s13 = smov %s929_s17  ;;  %20 = sbr.rel (!%p18_p2) target bundleno = 8 (0x8), region = 90 }
  0x77   :  { %408 = vsyncpa [#allocation3], 1 }
  0x78   :  { %410 = vsyncpa [#allocation3 + $0x1], 1 }
  0x79   :  { %411 = vsyncpa [#allocation6], 1 }
  0x7a   :  { %413 = vsyncpa [#allocation6 + $0x1], 1 }
  0x7b   :  { %414 = vsyncpa [#allocation4], 1 }
  0x7c   :  { %416 = vsyncpa [#allocation4 + $0x1], 1 }

</bundles_post_ra>
